<compile_context>
chip_gen: v7x
topology: tpu7x:2x2x1
jax: 0.10.0
libtpu: 0.0.40
codegen_flags: <defaults>
</compile_context>

<pallas_src>
import functools

import jax
import jax.numpy as jnp
from jax.experimental import pallas as pl
from jax.experimental.pallas import tpu as pltpu


def _conv1x1_kernel(x_ref, w_ref, b_ref, o_ref, *, compute_dtype):
    # x_ref: (Cin, tn)   activation tile (channels on sublanes, spatial on lanes), native dtype
    # w_ref: (Cout, Cin) weight, resident in VMEM across the whole grid (single-buffered)
    # b_ref: (Cout, 1)   bias column (f32)
    # o_ref: (Cout, tn)  output tile (lane-dense along the spatial tile)
    x = x_ref[...]
    w = w_ref[...]
    if compute_dtype is not None:
        # In-kernel cast: free VPU filler in a DMA-bound loop, avoids a separate HBM cast pass.
        x = x.astype(compute_dtype)
        w = w.astype(compute_dtype)
    acc = jnp.dot(w, x, preferred_element_type=jnp.float32)
    o_ref[...] = (acc + b_ref[...]).astype(o_ref.dtype)


def _vmem_capacity_bytes():
    try:
        cap = int(pltpu.get_tpu_info().vmem_capacity_bytes)
        if cap > 0:
            return cap
    except Exception:
        pass
    return 64 << 20  # conservative fallback (v7x-sized)


def _choose_tile(hw, batch, tn_cap):
    """Spatial (lane) tile: full extent if it fits, else a multiple of 128 (preferring one that
    divides hw so the last tile is never ragged); guarantee >=2 parallel grid steps if batch==1."""
    if hw <= tn_cap:
        tn = hw
        if batch == 1 and hw % 256 == 0:
            tn = hw // 2  # v7x: give both TensorCores a grid step; harmless on v5e/v6e
        return tn
    tn = max(128, (tn_cap // 128) * 128)
    # Prefer an exact divisor of hw (unmasked lane-dense stores) if it costs < 2x tile size.
    t = tn
    while t >= 128 and 2 * t > tn:
        if hw % t == 0:
            return t
        t -= 128
    return tn


def conv1x1(x_nchw, weight, bias, *, tn=None, compute_dtype=None, out_dtype=None):
    """1x1 conv, stride 1, padding 0, NCHW-native (== nn.Conv2d(C, C, 1).forward).

    x_nchw : (B, Cin, H, W)
    weight : (Cout, Cin, 1, 1)   (PyTorch Conv2d layout)
    bias   : (Cout,)
    tn     : optional spatial-tile override; default: auto-sized from the chip's VMEM budget
    compute_dtype: dtype fed to the MXU (None -> input dtype, exact f32 semantics).
                   Accumulation is always f32.
    out_dtype: output dtype (None -> x dtype).
    returns: (B, Cout, H, W)
    """
    B, Cin, H, W = x_nchw.shape
    Cout = weight.shape[0]
    HW = H * W
    if out_dtype is None:
        out_dtype = x_nchw.dtype

    # Pure reshapes (contiguous) -- no transpose, no extra HBM passes (casts happen in-kernel).
    x3d = x_nchw.reshape(B, Cin, HW)
    w2d = weight.reshape(Cout, Cin)
    b2d = bias.reshape(Cout, 1).astype(jnp.float32)

    isz = lambda dt: jnp.dtype(dt).itemsize
    x_isz, w_isz, o_isz = isz(x3d.dtype), isz(w2d.dtype), isz(out_dtype)

    # Per-generation VMEM budget with headroom (v7x 64MiB -> ~51MiB, v5e/v6e 128MiB -> ~102MiB).
    budget = int(_vmem_capacity_bytes() * 0.8)
    fixed = Cout * Cin * w_isz + Cout * 4 + (4 << 20)   # resident weight + bias + scratch headroom
    per_lane = 2 * (Cin * x_isz + Cout * o_isz)         # double-buffered x & out bytes per lane
    tn_cap = max(128, (budget - fixed) // per_lane)
    if tn is not None:
        tn_cap = min(tn_cap, max(128, int(tn)))
    tn = _choose_tile(HW, B, tn_cap)
    n_tiles = pl.cdiv(HW, tn)

    vmem_req = (2 * Cin * tn * x_isz + 2 * Cout * tn * o_isz
                + Cout * Cin * w_isz + Cout * 4 + (4 << 20))
    vmem_limit = int(min(max(vmem_req, 16 << 20), budget))

    kernel = functools.partial(_conv1x1_kernel, compute_dtype=compute_dtype)

    def build(invariant_spec_kwargs):
        return pl.pallas_call(
            kernel,
            out_shape=jax.ShapeDtypeStruct((B, Cout, HW), out_dtype),
            grid_spec=pltpu.PrefetchScalarGridSpec(
                num_scalar_prefetch=0,
                grid=(B, n_tiles),
                in_specs=[
                    # Activations: streamed per (batch, spatial-tile).
                    pl.BlockSpec((None, Cin, tn), lambda b, j: (b, 0, j)),
                    # Grid-invariant weight & bias: resident in VMEM, single-buffered.
                    pl.BlockSpec((Cout, Cin), lambda b, j: (0, 0), **invariant_spec_kwargs),
                    pl.BlockSpec((Cout, 1), lambda b, j: (0, 0), **invariant_spec_kwargs),
                ],
                out_specs=pl.BlockSpec((None, Cout, tn), lambda b, j: (b, 0, j)),
            ),
            compiler_params=pltpu.CompilerParams(
                dimension_semantics=("parallel", "parallel"),
                vmem_limit_bytes=vmem_limit,
            ),
        )

    try:
        out3d = build({"pipeline_mode": pl.Buffered(1)})(x3d, w2d, b2d)
    except Exception:
        # Fallback: default double-buffering for the invariant operands (tiny VMEM cost).
        out3d = build({})(x3d, w2d, b2d)

    # Free reshape back to NCHW (channels never moved).
    return out3d.reshape(B, Cout, H, W)


if __name__ == "__main__":
    # Small shapes consistent with the module (inchannels shrunk from 512, kept MXU-aligned).
    B, C, H, W = 2, 128, 16, 16

    key = jax.random.PRNGKey(0)
    kx, kw, kb = jax.random.split(key, 3)

    x = jax.random.normal(kx, (B, C, H, W), dtype=jnp.float32)
    weight = jax.random.normal(kw, (C, C, 1, 1), dtype=jnp.float32) * 0.02   # (Cout, Cin, 1, 1)
    bias = jax.random.normal(kb, (C,), dtype=jnp.float32) * 0.01

    # Pure-JAX f32 reference of the 1x1 conv (PyTorch Conv2d forward semantics).
    ref = jnp.einsum("bchw,oc->bohw", x, weight.reshape(C, C)) + bias[None, :, None, None]

    # Default path: exact module semantics (f32 compute, f32 accumulation).
    out = jax.block_until_ready(conv1x1(x, weight, bias))
    assert out.shape == (B, C, H, W)
    assert out.dtype == x.dtype
    assert jnp.allclose(out, ref, atol=1e-4, rtol=1e-4), float(jnp.max(jnp.abs(out - ref)))

    # Opt-in bf16 MXU compute (f32 accumulation) -- bf16-appropriate tolerance.
    out_bf16 = jax.block_until_ready(conv1x1(x, weight, bias, compute_dtype=jnp.bfloat16))
    assert jnp.allclose(out_bf16, ref, atol=2e-2, rtol=2e-2)

    print("KERNEL_OK")
</pallas_src>

<mosaic_0001>
module attributes {stable_mosaic.version = 11 : i64} {
  func.func @_conv1x1_kernel(%arg0: i32, %arg1: i32, %arg2: memref<1x128x256xf32, #tpu.memory_space<vmem>>, %arg3: memref<128x128xf32, #tpu.memory_space<vmem>>, %arg4: memref<128x1xf32, #tpu.memory_space<vmem>>, %arg5: memref<1x128x256xf32, #tpu.memory_space<vmem>>) attributes {dimension_semantics = [#tpu.dimension_semantics<parallel>, #tpu.dimension_semantics<parallel>], iteration_bounds = array<i64: 2, 1>, scalar_prefetch = 0 : i64, scratch_operands = 0 : i64, tpu.core_type = #tpu.core_type<tc>, window_params = [{transform_indices = @transform_0, window_bounds = array<i64: 1, 128, 256>}, {pipeline_mode = #tpu.pipeline_mode<synchronous>, transform_indices = @transform_1, window_bounds = array<i64: 128, 128>}, {pipeline_mode = #tpu.pipeline_mode<synchronous>, transform_indices = @transform_2, window_bounds = array<i64: 128, 1>}, {transform_indices = @transform_3, window_bounds = array<i64: 1, 128, 256>}]} {
    %c0 = arith.constant 0 : index
    %c0_0 = arith.constant 0 : index
    %c0_1 = arith.constant 0 : index
    %0 = vector.load %arg2[%c0, %c0_0, %c0_1] : memref<1x128x256xf32, #tpu.memory_space<vmem>>, vector<1x128x256xf32>
    %1 = vector.shape_cast %0 : vector<1x128x256xf32> to vector<128x256xf32>
    %c0_2 = arith.constant 0 : index
    %c0_3 = arith.constant 0 : index
    %2 = vector.load %arg3[%c0_2, %c0_3] : memref<128x128xf32, #tpu.memory_space<vmem>>, vector<128x128xf32>
    %cst = arith.constant dense<0.000000e+00> : vector<128x256xf32>
    %3 = tpu.matmul %2, %1, %cst {dimension_numbers = #tpu.dot_dimension_numbers<[1], [0], [0], [1], [0, 0, 1, 1], [], []>} : vector<128x128xf32>, vector<128x256xf32>, vector<128x256xf32> -> vector<128x256xf32>
    %c0_4 = arith.constant 0 : index
    %c0_5 = arith.constant 0 : index
    %4 = vector.load %arg4[%c0_4, %c0_5] : memref<128x1xf32, #tpu.memory_space<vmem>>, vector<128x1xf32>
    %5 = vector.broadcast %4 : vector<128x1xf32> to vector<128x256xf32>
    %6 = arith.addf %3, %5 : vector<128x256xf32>
    %c0_6 = arith.constant 0 : index
    %c0_7 = arith.constant 0 : index
    %c0_8 = arith.constant 0 : index
    %7 = vector.load %arg5[%c0_6, %c0_7, %c0_8] : memref<1x128x256xf32, #tpu.memory_space<vmem>>, vector<1x128x256xf32>
    %8 = vector.shape_cast %7 : vector<1x128x256xf32> to vector<128x256xf32>
    %9 = vector.shape_cast %6 : vector<128x256xf32> to vector<1x128x256xf32>
    tpu.vector_store %arg5[%c0_6, %c0_7, %c0_8], %9 {strides = array<i32>} : memref<1x128x256xf32, #tpu.memory_space<vmem>>, vector<1x128x256xf32>,
    return
  }
  func.func @transform_0(%arg0: i32, %arg1: i32) -> (i32, i32, i32) {
    %c0_i32 = arith.constant 0 : i32
    %c0_i32_0 = arith.constant 0 : i32
    return %arg0, %c0_i32, %arg1 : i32, i32, i32
  }
  func.func @transform_1(%arg0: i32, %arg1: i32) -> (i32, i32) {
    %c0_i32 = arith.constant 0 : i32
    %c0_i32_0 = arith.constant 0 : i32
    %c0_i32_1 = arith.constant 0 : i32
    return %c0_i32, %c0_i32_0 : i32, i32
  }
  func.func @transform_2(%arg0: i32, %arg1: i32) -> (i32, i32) {
    %c0_i32 = arith.constant 0 : i32
    %c0_i32_0 = arith.constant 0 : i32
    %c0_i32_1 = arith.constant 0 : i32
    return %c0_i32, %c0_i32_0 : i32, i32
  }
  func.func @transform_3(%arg0: i32, %arg1: i32) -> (i32, i32, i32) {
    %c0_i32 = arith.constant 0 : i32
    %c0_i32_0 = arith.constant 0 : i32
    return %arg0, %c0_i32, %arg1 : i32, i32, i32
  }
}

module attributes {stable_mosaic.version = 11 : i64} {
  func.func @_conv1x1_kernel(%arg0: i32, %arg1: i32, %arg2: memref<1x128x256xf32, #tpu.memory_space<vmem>>, %arg3: memref<128x128xf32, #tpu.memory_space<vmem>>, %arg4: memref<128x1xf32, #tpu.memory_space<vmem>>, %arg5: memref<1x128x256xf32, #tpu.memory_space<vmem>>) attributes {dimension_semantics = [#tpu.dimension_semantics<parallel>, #tpu.dimension_semantics<parallel>], iteration_bounds = array<i64: 2, 1>, scalar_prefetch = 0 : i64, scratch_operands = 0 : i64, tpu.core_type = #tpu.core_type<tc>, window_params = [{transform_indices = @transform_0, window_bounds = array<i64: 1, 128, 256>}, {pipeline_mode = #tpu.pipeline_mode<synchronous>, transform_indices = @transform_1, window_bounds = array<i64: 128, 128>}, {pipeline_mode = #tpu.pipeline_mode<synchronous>, transform_indices = @transform_2, window_bounds = array<i64: 128, 1>}, {transform_indices = @transform_3, window_bounds = array<i64: 1, 128, 256>}]} {
    %c0 = arith.constant 0 : index
    %c0_0 = arith.constant 0 : index
    %c0_1 = arith.constant 0 : index
    %0 = vector.load %arg2[%c0, %c0_0, %c0_1] : memref<1x128x256xf32, #tpu.memory_space<vmem>>, vector<1x128x256xf32>
    %1 = vector.shape_cast %0 : vector<1x128x256xf32> to vector<128x256xf32>
    %c0_2 = arith.constant 0 : index
    %c0_3 = arith.constant 0 : index
    %2 = vector.load %arg3[%c0_2, %c0_3] : memref<128x128xf32, #tpu.memory_space<vmem>>, vector<128x128xf32>
    %cst = arith.constant dense<0.000000e+00> : vector<128x256xf32>
    %3 = tpu.matmul %2, %1, %cst {dimension_numbers = #tpu.dot_dimension_numbers<[1], [0], [0], [1], [0, 0, 1, 1], [], []>} : vector<128x128xf32>, vector<128x256xf32>, vector<128x256xf32> -> vector<128x256xf32>
    %c0_4 = arith.constant 0 : index
    %c0_5 = arith.constant 0 : index
    %4 = vector.load %arg4[%c0_4, %c0_5] : memref<128x1xf32, #tpu.memory_space<vmem>>, vector<128x1xf32>
    %5 = vector.broadcast %4 : vector<128x1xf32> to vector<128x256xf32>
    %6 = arith.addf %3, %5 : vector<128x256xf32>
    %c0_6 = arith.constant 0 : index
    %c0_7 = arith.constant 0 : index
    %c0_8 = arith.constant 0 : index
    %7 = vector.load %arg5[%c0_6, %c0_7, %c0_8] : memref<1x128x256xf32, #tpu.memory_space<vmem>>, vector<1x128x256xf32>
    %8 = vector.shape_cast %7 : vector<1x128x256xf32> to vector<128x256xf32>
    %9 = vector.shape_cast %6 : vector<128x256xf32> to vector<1x128x256xf32>
    tpu.vector_store %arg5[%c0_6, %c0_7, %c0_8], %9 {strides = array<i32>} : memref<1x128x256xf32, #tpu.memory_space<vmem>>, vector<1x128x256xf32>,
    return
  }
  func.func @transform_0(%arg0: i32, %arg1: i32) -> (i32, i32, i32) {
    %c0_i32 = arith.constant 0 : i32
    %c0_i32_0 = arith.constant 0 : i32
    return %arg0, %c0_i32, %arg1 : i32, i32, i32
  }
  func.func @transform_1(%arg0: i32, %arg1: i32) -> (i32, i32) {
    %c0_i32 = arith.constant 0 : i32
    %c0_i32_0 = arith.constant 0 : i32
    %c0_i32_1 = arith.constant 0 : i32
    return %c0_i32, %c0_i32_0 : i32, i32
  }
  func.func @transform_2(%arg0: i32, %arg1: i32) -> (i32, i32) {
    %c0_i32 = arith.constant 0 : i32
    %c0_i32_0 = arith.constant 0 : i32
    %c0_i32_1 = arith.constant 0 : i32
    return %c0_i32, %c0_i32_0 : i32, i32
  }
  func.func @transform_3(%arg0: i32, %arg1: i32) -> (i32, i32, i32) {
    %c0_i32 = arith.constant 0 : i32
    %c0_i32_0 = arith.constant 0 : i32
    return %arg0, %c0_i32, %arg1 : i32, i32, i32
  }
}

</mosaic_0001>

<bundles_post_ra>
// kernel: tpu_custom_call.1
= control target key start
LH: loop header
LB: loop body
LE: loop exit
PB: predicated region body
PF: predicated region fallthrough
CT: control target
= control target key end

     0   :  { %8 = vsyncpa [#allocation3], 0  ;;  %s1302_s0 = inlined_call_operand.hbm [shape: f32[2,128,256], index: 0, kind: input, shape index: {}]   ;;  %s1303_s1 = inlined_call_operand.vmem [shape: f32[128,128], index: 1, kind: input, shape index: {}]   ;;  %s1304_s2 = inlined_call_operand.vmem [shape: f32[128,1], index: 2, kind: input, shape index: {}]   ;;  %s1305_s3 = inlined_call_operand.hbm [shape: f32[2,128,256], index: 3, kind: output, shape index: {}]  }
   0x1   :  { %10 = vsyncpa [#allocation3 + $0x1], 0 }
   0x2   :  { %11 = vsyncpa [#allocation4], 0 }
   0x3   :  { %13 = vsyncpa [#allocation4 + $0x1], 0  ;;  %s926_s12 = smov 0   ;;  %s928_s13 = smov 0  }
   0x4   :  { %s930_s14 = smov 0   ;;  %s932_s15 = smov 0  }
   0x5   :  { %s934_s16 = smov 0   ;;  %s936_s17 = smov 0  }
   0x6 LB: > { %s649_s18 = sadd.s32 4294967295, %s896_s17   ;;  %s650_s19 = sadd.s32 4294967294, %s896_s17   ;;  %s896_s17 = sphi %s936_s17, %s19_s17   ;;  %s892_s16 = sphi %s934_s16, %s1320_s16   ;;  %s888_s15 = sphi %s932_s15, %s1319_s15   ;;  %s884_s14 = sphi %s930_s14, %s1318_s14   ;;  %s880_s13 = sphi %s928_s13, %s1317_s13   ;;  %s876_s12 = sphi %s926_s12, %s1316_s12  }
   0x7   : > { %s31_s20 = sadd.s32 1, %s892_s16  ;;  %s40_s21 = sadd.s32 1, %s884_s14 }
   0x8   : > { %p33_p0 = scmp.ge.s32.totalorder %s31_s20, 2  ;;  %p47_p1 = scmp.ne.s32.totalorder %s884_s14, %s880_s13 }
   0x9   : > { %p48_p2 = scmp.eq.s32.totalorder %s896_s17, 0  ;;  %p53_p3 = scmp.ne.s32.totalorder %s880_s13, %s876_s12 }
   0xa   : > { %s1322_s20 = smov (%p33_p0, %s31_s20), 0  ;;  %p54_p5 = scmp.eq.s32.totalorder %s649_s18, 0 }
   0xb   : > { %p967_p4 = por %p48_p2, %p47_p1  ;;  %s35_s23 = ssub.s32 %s892_s16, %s1322_s20 }
   0xc   : > { %p121_p6 = scmp.eq.s32.totalorder %s649_s18, 1  ;;  %p38_p7 = scmp.eq.s32.totalorder %s35_s23, 0 }
   0xd   : > { %p973_p8 = por %p54_p5, %p53_p3  ;;  %p127_p10 = scmp.eq.s32.totalorder %s650_s19, 1 }
   0xe   : > { %p977_p9 = por %p121_p6, %p47_p1  ;;  %p726_p13 = scmp.lt.s32.totalorder %s896_s17, 2 }
   0xf   : > { %s982_s26 = scalar_select %p38_p7, %s884_s14, %s40_s21  }
  0x10   : > { %s1309_s25 = scalar_select %p977_p9, 1, 0 }
  0x11   : > { %p984_p11 = por %p127_p10, %p53_p3  ;;  %s153_s28 = sand.u32 1, %s884_s14  }
  0x12   : > { %s653_s29 = sshll.u32 %s153_s28, 8  ;;  %s664_s30 = sshll.u32 %s892_s16, 12 }
  0x13   : > { %s1310_s27 = scalar_select %p984_p11, 1, 0 }
  0x14   : > { %s995_s6 = scalar_lea.hbm %s1302_s0, %s664_s30  ;;  %s157_s7 = scalar_lea.vmem [#allocation2], %s653_s29 }
  0x15   : > { %s166_s8 = sshll.u32 %s157_s7, 4  ;;  %p1001_p0 = pnand %p726_p13, %p967_p4  ;;  %s997_s8 = int_to_ptr.vmem [resolvable:$true] %s166_s8 }
  0x16   : > { %s1006_s10 = scalar_lea.sflag [#allocation3], %s153_s28  ;;  %s784_s11 = scalar_lea.hbm %s995_s6, 4096 }
  0x17   : > { %p785_p2 = scmp.ne.s32.totalorder %s995_s6, %s784_s11  ;;  %p786_p3 = pneg %p1001_p0 }
  0x18   : > { %s789_s21 = scalar_lea.hbm %s1302_s0, 8192  ;;  %p790_p4 = scmp.lt.u32.totalorder %s995_s6, %s1302_s0 }
  0x19   : > { %p787_p5 = pnand %p786_p3, %p785_p2  ;;  %p791_p7 = scmp.lt.u32.totalorder %s789_s21, %s784_s11 }
  0x1a   : > { %p793_p13 = scmp.lt.u32.totalorder %s784_s11, %s995_s6 }
  0x1b   : > { %p788_p6 = pneg %p787_p5  ;;  %p792_p10 = por %p791_p7, %p790_p4 }
  0x1d   : > { %p794_p12 = por %p793_p13, %p792_p10 }
  0x1f   : > { %p795_p1 = pnand %p794_p12, %p788_p6 }
  0x21   : > { %798 = shalt.err (!%p795_p1)
}
  0x22   : > { %s799_s28 = scalar_lea.vmem %s997_s8, 4096  ;;  %s898_s29 = smov [#allocation2]  }
  0x23   : > { %p800_p2 = scmp.ne.s32.totalorder %s997_s8, %s799_s28  ;;  %s804_s30 = sshll.u32 %s898_s29, 4  ;;  %s805_s30 = int_to_ptr.vmem [resolvable:$false] %s804_s30 }
  0x24   : > { %s806_s4 = scalar_lea.vmem %s805_s30, 8192  ;;  %p807_p9 = scmp.lt.s32.totalorder %s997_s8, %s805_s30 }
  0x25   : > { %p802_p5 = pnand %p800_p2, %p786_p3  ;;  %p808_p4 = scmp.lt.s32.totalorder %s806_s4, %s799_s28 }
  0x27   : > { %p803_p11 = pneg %p802_p5  ;;  %p809_p7 = por %p808_p4, %p807_p9 }
  0x29   : > { %p810_p10 = pnand %p809_p7, %p803_p11 }
  0x2b   : > { %813 = shalt.err (!%p810_p10)
}
  0x2c   : > { %s899_s5 = smov 256   ;;  %s900_s7 = smov 16  }
  0x2d   : > { %721 = dma.hbm_to_vmem [thread:$0]  (!%p1001_p0), %s995_s6, 4096, %s997_s8, %s1006_s10, %s899_s5, %s899_s5, %s900_s7  }
  0x2e   : > { %p174_p12 = scmp.lt.s32.totalorder %s896_s17, 3  ;;  %p1312_p1 = scmp.ge.s32.totalorder %s896_s17, 1 }
  0x30   : > { %p175_p3 = pnand %p1312_p1, %p174_p12 }
  0x31   : > { %s1038_s11 = sand.u32 (!%p175_p3), 1, %s880_s13  }
  0x32   : > { %178 = sbr.rel (%p175_p3) target bundleno = 351 (0x15f), region = 32  ;;  %s657_s18 = sshll.u32 (!%p175_p3), %s1038_s11, 8 }
  0x33   : > { %s181_s19 = scalar_lea.sflag (!%p175_p3), [#allocation3], %s1038_s11  ;;  %s1044_s21 = scalar_lea.vmem (!%p175_p3), [#allocation2], %s657_s18 }
  0x39   : > { %867 = dma.done.wait (%p973_p8), %s181_s19, 4096  }
  0x3a   : > { %869 = vsyncadd (%p973_p8), %s181_s19, 4294963200  ;;  %v901_v0 = vmov 0.0   ;;  %v902_v1 = vmov 0   ;;  %v210_v2 = vld [vmem:[%s1044_s21 + $0x8] sm:$0xff]  ;;  %v212_v3 = vld [vmem:[%s1044_s21 + $0x18] sm:$0xff]  ;;  %s1204_s10 = scalar_lea.vmem [#allocation5], %s657_s18 }
  0x3b   : > { %417 = vmatprep.mubr.f32.mxu0 %v901_v0  ;;  %465 = vmatprep.mubr.f32.mxu1 %v901_v0  ;;  %v209_v4 = vld [vmem:[%s1044_s21] sm:$0xff]  ;;  %v666_v5 = vpack.c.bf16 %v212_v3, %v210_v2  ;;  %v211_v6 = vld [vmem:[%s1044_s21 + $0x10] sm:$0xff]  ;;  %v214_v7 = vld [vmem:[%s1044_s21 + $0x28] sm:$0xff]  ;;  %s665_s18 = sshll.u32 %s888_s15, 12  ;;  %s562_s22 = sshll.u32 %s1204_s10, 4  ;;  %s1248_s22 = int_to_ptr.vmem [resolvable:$true] %s562_s22 }
  0x3c   : > { %783 = vset.pattern.permute.xlu1 %v902_v1  ;;  %782 = vset.pattern.permute.xlu0 %v902_v1  ;;  %v216_v8 = vld [vmem:[%s1044_s21 + $0x38] sm:$0xff]  ;;  %v668_v9 = vpack.c.bf16 %v211_v6, %v209_v4  ;;  %v213_v11 = vld [vmem:[%s1044_s21 + $0x20] sm:$0xff]  ;;  %v215_v12 = vld [vmem:[%s1044_s21 + $0x30] sm:$0xff]  ;;  %s1246_s28 = scalar_lea.hbm %s1305_s3, %s665_s18  ;;  %s547_s29 = scalar_lea.sflag [#allocation4], %s1038_s11 }
  0x3d   : > { %v670_v10 = vpack.c.bf16 %v216_v8, %v214_v7  ;;  %v218_v13 = vld [vmem:[%s1044_s21 + $0x48] sm:$0xff]  ;;  %667 = vmatprep.subr.bf16.mxu0 %v666_v5  ;;  %698 = vmatprep.subr.bf16.mxu1 %v666_v5  ;;  %v220_v14 = vld [vmem:[%s1044_s21 + $0x58] sm:$0xff]  ;;  %v672_v15 = vpack.c.bf16 %v215_v12, %v213_v11  ;;  %v217_v17 = vld [vmem:[%s1044_s21 + $0x40] sm:$0xff]  ;;  %s814_s30 = scalar_lea.vmem %s1248_s22, 4096  ;;  %p1313_p9 = scmp.ne.s32.totalorder %s1309_s25, 0 }
  0x3e   : > { %669 = vmatpush1.bf16.msra.mxu0 %v668_v9  ;;  %706 = vmatpush1.bf16.msra.mxu1 %v668_v9  ;;  %v674_v16 = vpack.c.bf16 %v220_v14, %v218_v13  ;;  %v219_v18 = vld [vmem:[%s1044_s21 + $0x50] sm:$0xff]  ;;  %v222_v19 = vld [vmem:[%s1044_s21 + $0x68] sm:$0xff]  ;;  %v224_v20 = vld [vmem:[%s1044_s21 + $0x78] sm:$0xff]  ;;  %p815_p8 = scmp.ne.s32.totalorder %s1248_s22, %s814_s30  ;;  %s903_s4 = smov [#allocation5]  }
  0x3f   : > { %671 = vmatprep.subr.bf16.mxu0 %v670_v10  ;;  %699 = vmatprep.subr.bf16.mxu1 %v670_v10  ;;  %v676_v21 = vpack.c.bf16 %v219_v18, %v217_v17  ;;  %v678_v22 = vpack.c.bf16 %v224_v20, %v222_v19  ;;  %v221_v23 = vld [vmem:[%s1044_s21 + $0x60] sm:$0xff]  ;;  %v223_v24 = vld [vmem:[%s1044_s21 + $0x70] sm:$0xff]  ;;  %v226_v25 = vld [vmem:[%s1044_s21 + $0x88] sm:$0xff]  ;;  %s818_s5 = sshll.u32 %s903_s4, 4  ;;  %s819_s5 = int_to_ptr.vmem [resolvable:$false] %s818_s5 }
  0x40   : > { %v228_v26 = vld [vmem:[%s1044_s21 + $0x98] sm:$0xff]  ;;  %v680_v27 = vpack.c.bf16 %v223_v24, %v221_v23  ;;  %v225_v29 = vld [vmem:[%s1044_s21 + $0x80] sm:$0xff]  ;;  %v227_v30 = vld [vmem:[%s1044_s21 + $0x90] sm:$0xff]  ;;  %p816_p11 = pnand %p815_p8, %p1313_p9  ;;  %s820_s7 = scalar_lea.vmem %s819_s5, 8192 }
  0x41   : > { %v682_v28 = vpack.c.bf16 %v228_v26, %v226_v25  ;;  %v230_v31 = vld [vmem:[%s1044_s21 + $0xa8] sm:$0xff]  ;;  %v232_v32 = vld [vmem:[%s1044_s21 + $0xb8] sm:$0xff]  ;;  %v684_v33 = vpack.c.bf16 %v227_v30, %v225_v29  ;;  %v259_v34 = vld [vmem:[%s1304_s2 + $0x10] sm:$0xff]  ;;  %p821_p6 = scmp.lt.s32.totalorder %s1248_s22, %s819_s5  ;;  %p822_p13 = scmp.lt.s32.totalorder %s820_s7, %s814_s30 }
  0x42   : > { %673 = vmatpush1.bf16.msra.mxu0 %v672_v15  ;;  %707 = vmatpush1.bf16.msra.mxu1 %v672_v15  ;;  %v257_v35 = vld [vmem:[%s1304_s2] sm:$0xff]  ;;  %v686_v36 = vpack.c.bf16 %v232_v32, %v230_v31  ;;  %v231_v38 = vld [vmem:[%s1044_s21 + $0xb0] sm:$0xff]  ;;  %v234_v39 = vld [vmem:[%s1044_s21 + $0xc8] sm:$0xff]  ;;  %p817_p0 = pneg %p816_p11 }
  0x43   : > { %675 = vmatprep.subr.bf16.mxu0 %v674_v16  ;;  %700 = vmatprep.subr.bf16.mxu1 %v674_v16  ;;  %v229_v37 = vld [vmem:[%s1044_s21 + $0xa0] sm:$0xff]  ;;  %v236_v40 = vld [vmem:[%s1044_s21 + $0xd8] sm:$0xff]  ;;  %v258_v42 = vld [vmem:[%s1304_s2 + $0x8] sm:$0xff]  ;;  %p823_p2 = por %p822_p13, %p821_p6 }
  0x44   : > { %285 = vperm.xlu1 %783, %v259_v34   ;;  %275 = vperm.xlu0 %782, %v257_v35   ;;  %v260_v41 = vld [vmem:[%s1304_s2 + $0x18] sm:$0xff]  ;;  %v688_v43 = vpack.c.bf16 %v231_v38, %v229_v37  ;;  %v690_v44 = vpack.c.bf16 %v236_v40, %v234_v39  ;;  %v233_v45 = vld [vmem:[%s1044_s21 + $0xc0] sm:$0xff]  ;;  %v235_v46 = vld [vmem:[%s1044_s21 + $0xd0] sm:$0xff] }
  0x45   : > { %v238_v47 = vld [vmem:[%s1044_s21 + $0xe8] sm:$0xff]  ;;  %v240_v48 = vld [vmem:[%s1044_s21 + $0xf8] sm:$0xff]  ;;  %v261_v50 = vld [vmem:[%s1304_s2 + $0x20] sm:$0xff]  ;;  %v692_v51 = vpack.c.bf16 %v235_v46, %v233_v45  ;;  %p824_p5 = pnand %p823_p2, %p817_p0 }
  0x46   : > { %677 = vmatpush1.bf16.msra.mxu0 %v676_v21  ;;  %708 = vmatpush1.bf16.msra.mxu1 %v676_v21  ;;  %v262_v49 = vld [vmem:[%s1304_s2 + $0x28] sm:$0xff]  ;;  %v694_v52 = vpack.c.bf16 %v240_v48, %v238_v47  ;;  %v237_v53 = vld [vmem:[%s1044_s21 + $0xe0] sm:$0xff]  ;;  %v239_v54 = vld [vmem:[%s1044_s21 + $0xf0] sm:$0xff] }
  0x47   : > { %679 = vmatprep.subr.bf16.mxu0 %v678_v22  ;;  %701 = vmatprep.subr.bf16.mxu1 %v678_v22  ;;  %v264_v55 = vld [vmem:[%s1304_s2 + $0x38] sm:$0xff]  ;;  %v263_v56 = vld [vmem:[%s1304_s2 + $0x30] sm:$0xff]  ;;  %v696_v57 = vpack.c.bf16 %v239_v54, %v237_v53  ;;  %v266_v58 = vld [vmem:[%s1304_s2 + $0x48] sm:$0xff] }
  0x48   : > { %290 = vperm.xlu1 %783, %v260_v41   ;;  %280 = vperm.xlu0 %782, %v258_v42   ;;  %v265_v59 = vld [vmem:[%s1304_s2 + $0x40] sm:$0xff]  ;;  %v268_v62 = vld [vmem:[%s1304_s2 + $0x58] sm:$0xff]  ;;  %v267_v63 = vld [vmem:[%s1304_s2 + $0x50] sm:$0xff] }
  0x49   : > { %v241_v60 = vld [vmem:[%s1303_s1] sm:$0xff]  ;;  %v242_v1 = vld [vmem:[%s1303_s1 + $0x8] sm:$0xff]  ;;  %v243_v5 = vld [vmem:[%s1303_s1 + $0x10] sm:$0xff] }
  0x4a   : > { %681 = vmatpush1.bf16.msra.mxu0 %v680_v27  ;;  %709 = vmatpush1.bf16.msra.mxu1 %v680_v27  ;;  %v249_v61 = vld [vmem:[%s1303_s1 + $0x40] sm:$0xff]  ;;  %v250_v2 = vld [vmem:[%s1303_s1 + $0x48] sm:$0xff]  ;;  %v251_v6 = vld [vmem:[%s1303_s1 + $0x50] sm:$0xff] }
  0x4b   : > { %683 = vmatprep.subr.bf16.mxu0 %v682_v28  ;;  %702 = vmatprep.subr.bf16.mxu1 %v682_v28  ;;  %v270_v3 = vld [vmem:[%s1304_s2 + $0x68] sm:$0xff]  ;;  %v269_v4 = vld [vmem:[%s1304_s2 + $0x60] sm:$0xff]  ;;  %v272_v7 = vld [vmem:[%s1304_s2 + $0x78] sm:$0xff] }
  0x4c   : > { %300 = vperm.xlu1 %783, %v262_v49   ;;  %295 = vperm.xlu0 %782, %v261_v50   ;;  %v271_v8 = vld [vmem:[%s1304_s2 + $0x70] sm:$0xff]  ;;  %v244_v9 = vld [vmem:[%s1303_s1 + $0x18] sm:$0xff]  ;;  %v245_v11 = vld [vmem:[%s1303_s1 + $0x20] sm:$0xff] }
  0x4d   : > { %v252_v10 = vld [vmem:[%s1303_s1 + $0x58] sm:$0xff]  ;;  %v253_v12 = vld [vmem:[%s1303_s1 + $0x60] sm:$0xff]  ;;  %v246_v13 = vld [vmem:[%s1303_s1 + $0x28] sm:$0xff] }
  0x4e   : > { %685 = vmatpush1.bf16.msra.mxu0 %v684_v33  ;;  %710 = vmatpush1.bf16.msra.mxu1 %v684_v33  ;;  %v254_v14 = vld [vmem:[%s1303_s1 + $0x68] sm:$0xff]  ;;  %v247_v15 = vld [vmem:[%s1303_s1 + $0x30] sm:$0xff]  ;;  %v248_v17 = vld [vmem:[%s1303_s1 + $0x38] sm:$0xff] }
  0x4f   : > { %687 = vmatprep.subr.bf16.mxu0 %v686_v36  ;;  %703 = vmatprep.subr.bf16.mxu1 %v686_v36  ;;  %v255_v16 = vld [vmem:[%s1303_s1 + $0x70] sm:$0xff]  ;;  %v256_v18 = vld [vmem:[%s1303_s1 + $0x78] sm:$0xff] }
  0x50   : > { %310 = vperm.xlu1 %783, %v264_v55   ;;  %305 = vperm.xlu0 %782, %v263_v56  }
  0x52   : > { %689 = vmatpush1.bf16.msra.mxu0 %v688_v43  ;;  %711 = vmatpush1.bf16.msra.mxu1 %v688_v43 }
  0x53   : > { %691 = vmatprep.subr.bf16.mxu0 %v690_v44  ;;  %704 = vmatprep.subr.bf16.mxu1 %v690_v44 }
  0x54   : > { %320 = vperm.xlu1 %783, %v266_v58   ;;  %315 = vperm.xlu0 %782, %v265_v59  }
  0x56   : > { %693 = vmatpush1.bf16.msra.mxu0 %v692_v51  ;;  %712 = vmatpush1.bf16.msra.mxu1 %v692_v51 }
  0x57   : > { %695 = vmatprep.subr.bf16.mxu0 %v694_v52  ;;  %705 = vmatprep.subr.bf16.mxu1 %v694_v52 }
  0x58   : > { %330 = vperm.xlu1 %783, %v268_v62   ;;  %325 = vperm.xlu0 %782, %v267_v63  }
  0x5a   : > { %697 = vmatpush1.bf16.msra.mxu0 %v696_v57  ;;  %713 = vmatpush1.bf16.msra.mxu1 %v696_v57 }
  0x5c   : > { %340 = vperm.xlu1 %783, %v270_v3   ;;  %335 = vperm.xlu0 %782, %v269_v4  }
  0x5d   : > { %418 = vmatmul.mubr.f32.vlgmr.msra.gmra.mrb[0].mxu0 %v241_v60  ;;  %466 = vmatmul.mubr.f32.vlgmr.msra.gmra.mrb[0].mxu1 %v249_v61 }
  0x5e   : > { %423 = vmatprep.mubr.f32.mxu0 %v901_v0  ;;  %471 = vmatprep.mubr.f32.mxu1 %v901_v0 }
  0x60   : > { %350 = vperm.xlu1 %783, %v272_v7   ;;  %345 = vperm.xlu0 %782, %v271_v8  }
  0x61   : > { %424 = vmatmul.mubr.f32.gmra.mrb[2].mxu0 %v242_v1  ;;  %472 = vmatmul.mubr.f32.gmra.mrb[2].mxu1 %v250_v2 }
  0x62   : > { %429 = vmatprep.mubr.f32.mxu0 %v901_v0  ;;  %477 = vmatprep.mubr.f32.mxu1 %v901_v0 }
  0x65   : > { %430 = vmatmul.mubr.f32.gmra.mrb[4].mxu0 %v243_v5  ;;  %478 = vmatmul.mubr.f32.gmra.mrb[4].mxu1 %v251_v6 }
  0x66   : > { %435 = vmatprep.mubr.f32.mxu0 %v901_v0  ;;  %483 = vmatprep.mubr.f32.mxu1 %v901_v0 }
  0x69   : > { %436 = vmatmul.mubr.f32.gmra.mrb[6].mxu0 %v244_v9  ;;  %484 = vmatmul.mubr.f32.gmra.mrb[6].mxu1 %v252_v10 }
  0x6a   : > { %441 = vmatprep.mubr.f32.mxu0 %v901_v0  ;;  %489 = vmatprep.mubr.f32.mxu1 %v901_v0 }
  0x6d   : > { %442 = vmatmul.mubr.f32.gmra.mrb[8].mxu0 %v245_v11  ;;  %490 = vmatmul.mubr.f32.gmra.mrb[8].mxu1 %v253_v12 }
  0x6e   : > { %447 = vmatprep.mubr.f32.mxu0 %v901_v0  ;;  %495 = vmatprep.mubr.f32.mxu1 %v901_v0 }
  0x71   : > { %448 = vmatmul.mubr.f32.gmra.mrb[10].mxu0 %v246_v13  ;;  %496 = vmatmul.mubr.f32.gmra.mrb[10].mxu1 %v254_v14 }
  0x72   : > { %453 = vmatprep.mubr.f32.mxu0 %v901_v0  ;;  %501 = vmatprep.mubr.f32.mxu1 %v901_v0 }
  0x75   : > { %454 = vmatmul.mubr.f32.gmra.mrb[12].mxu0 %v247_v15  ;;  %502 = vmatmul.mubr.f32.gmra.mrb[12].mxu1 %v255_v16 }
  0x76   : > { %459 = vmatprep.mubr.f32.mxu0 %v901_v0  ;;  %507 = vmatprep.mubr.f32.mxu1 %v901_v0 }
  0x79   : > { %460 = vmatmul.mubr.f32.gmra.mrb[14].mxu0 %v248_v17  ;;  %508 = vmatmul.mubr.f32.gmra.mrb[14].mxu1 %v256_v18 }
  0xc3   : > { %v276_v19 = vpop.permute.xlu0 %275  ;;  %v286_v20 = vpop.permute.xlu1 %285 }
  0xc7   : > { %v281_v21 = vpop.permute.xlu0 %280  ;;  %v291_v22 = vpop.permute.xlu1 %290 }
  0xcb   : > { %v1194_v23 = vpop.permute.xlu0 %295  ;;  %v1196_v24 = vpop.permute.xlu1 %300 }
  0xcf   : > { %v1198_v0 = vpop.permute.xlu0 %305  ;;  %v1200_v25 = vpop.permute.xlu1 %310 }
  0xd3   : > { %v316_v26 = vpop.permute.xlu0 %315  ;;  %v321_v35 = vpop.permute.xlu1 %320 }
  0xd7   : > { %v326_v44 = vpop.permute.xlu0 %325  ;;  %v331_v53 = vpop.permute.xlu1 %330 }
  0xdb   : > { %v336_v62 = vpop.permute.xlu0 %335  ;;  %v341_v8 = vpop.permute.xlu1 %340 }
  0xdf   : > { %v346_v17 = vpop.permute.xlu0 %345 }
 0x130   : > { %v419_v27 = vpop.f32.mrb[0].mxu0  ;;  %v467_v28 = vpop.f32.mrb[0].mxu1 }
 0x131   : > { %v420_v29 = vadd.f32 %v419_v27, %v276_v19  ;;  %v468_v30 = vadd.f32 %v467_v28, %v316_v26  ;;  %v421_v31 = vpop.f32.mrb[1].mxu0  ;;  %v469_v32 = vpop.f32.mrb[1].mxu1 }
 0x132   : > { %v422_v33 = vadd.f32 %v421_v31, %v276_v19  ;;  %v470_v34 = vadd.f32 %v469_v32, %v316_v26  ;;  %v351_v27 = vpop.permute.xlu1 %350 }
 0x133   : > { %514 = vst [vmem:[%s1204_s10] sm:$0xff] %v420_v29  ;;  %530 = vst [vmem:[%s1204_s10 + $0x80] sm:$0xff] %v468_v30 }
 0x134   : > { %515 = vst [vmem:[%s1204_s10 + $0x8] sm:$0xff] %v422_v33  ;;  %531 = vst [vmem:[%s1204_s10 + $0x88] sm:$0xff] %v470_v34  ;;  %v425_v36 = vpop.f32.mrb[2].mxu0  ;;  %v473_v37 = vpop.f32.mrb[2].mxu1 }
 0x135   : > { %v426_v38 = vadd.f32 %v425_v36, %v281_v21  ;;  %v474_v39 = vadd.f32 %v473_v37, %v321_v35  ;;  %v427_v40 = vpop.f32.mrb[3].mxu0  ;;  %v475_v41 = vpop.f32.mrb[3].mxu1 }
 0x136   : > { %v428_v42 = vadd.f32 %v427_v40, %v281_v21  ;;  %v476_v43 = vadd.f32 %v475_v41, %v321_v35 }
 0x137   : > { %516 = vst [vmem:[%s1204_s10 + $0x10] sm:$0xff] %v426_v38  ;;  %532 = vst [vmem:[%s1204_s10 + $0x90] sm:$0xff] %v474_v39 }
 0x138   : > { %517 = vst [vmem:[%s1204_s10 + $0x18] sm:$0xff] %v428_v42  ;;  %533 = vst [vmem:[%s1204_s10 + $0x98] sm:$0xff] %v476_v43  ;;  %v431_v45 = vpop.f32.mrb[4].mxu0  ;;  %v479_v46 = vpop.f32.mrb[4].mxu1 }
 0x139   : > { %v432_v47 = vadd.f32 %v431_v45, %v286_v20  ;;  %v480_v48 = vadd.f32 %v479_v46, %v326_v44  ;;  %v433_v49 = vpop.f32.mrb[5].mxu0  ;;  %v481_v50 = vpop.f32.mrb[5].mxu1 }
 0x13a   : > { %v434_v51 = vadd.f32 %v433_v49, %v286_v20  ;;  %v482_v52 = vadd.f32 %v481_v50, %v326_v44 }
 0x13b   : > { %518 = vst [vmem:[%s1204_s10 + $0x20] sm:$0xff] %v432_v47  ;;  %534 = vst [vmem:[%s1204_s10 + $0xa0] sm:$0xff] %v480_v48 }
 0x13c   : > { %519 = vst [vmem:[%s1204_s10 + $0x28] sm:$0xff] %v434_v51  ;;  %535 = vst [vmem:[%s1204_s10 + $0xa8] sm:$0xff] %v482_v52  ;;  %v437_v54 = vpop.f32.mrb[6].mxu0  ;;  %v485_v55 = vpop.f32.mrb[6].mxu1 }
 0x13d   : > { %v438_v56 = vadd.f32 %v437_v54, %v291_v22  ;;  %v486_v57 = vadd.f32 %v485_v55, %v331_v53  ;;  %v439_v58 = vpop.f32.mrb[7].mxu0  ;;  %v487_v59 = vpop.f32.mrb[7].mxu1 }
 0x13e   : > { %v440_v60 = vadd.f32 %v439_v58, %v291_v22  ;;  %v488_v61 = vadd.f32 %v487_v59, %v331_v53 }
 0x13f   : > { %520 = vst [vmem:[%s1204_s10 + $0x30] sm:$0xff] %v438_v56  ;;  %536 = vst [vmem:[%s1204_s10 + $0xb0] sm:$0xff] %v486_v57 }
 0x140   : > { %521 = vst [vmem:[%s1204_s10 + $0x38] sm:$0xff] %v440_v60  ;;  %537 = vst [vmem:[%s1204_s10 + $0xb8] sm:$0xff] %v488_v61  ;;  %v443_v63 = vpop.f32.mrb[8].mxu0  ;;  %v491_v1 = vpop.f32.mrb[8].mxu1 }
 0x141   : > { %v444_v2 = vadd.f32 %v443_v63, %v1194_v23  ;;  %v492_v3 = vadd.f32 %v491_v1, %v336_v62  ;;  %v445_v4 = vpop.f32.mrb[9].mxu0  ;;  %v493_v5 = vpop.f32.mrb[9].mxu1 }
 0x142   : > { %v446_v6 = vadd.f32 %v445_v4, %v1194_v23  ;;  %v494_v7 = vadd.f32 %v493_v5, %v336_v62 }
 0x143   : > { %522 = vst [vmem:[%s1204_s10 + $0x40] sm:$0xff] %v444_v2  ;;  %538 = vst [vmem:[%s1204_s10 + $0xc0] sm:$0xff] %v492_v3 }
 0x144   : > { %523 = vst [vmem:[%s1204_s10 + $0x48] sm:$0xff] %v446_v6  ;;  %539 = vst [vmem:[%s1204_s10 + $0xc8] sm:$0xff] %v494_v7  ;;  %v449_v9 = vpop.f32.mrb[10].mxu0  ;;  %v497_v10 = vpop.f32.mrb[10].mxu1 }
 0x145   : > { %v450_v11 = vadd.f32 %v449_v9, %v1196_v24  ;;  %v498_v12 = vadd.f32 %v497_v10, %v341_v8  ;;  %v451_v13 = vpop.f32.mrb[11].mxu0  ;;  %v499_v14 = vpop.f32.mrb[11].mxu1 }
 0x146   : > { %v452_v15 = vadd.f32 %v451_v13, %v1196_v24  ;;  %v500_v16 = vadd.f32 %v499_v14, %v341_v8 }
 0x147   : > { %524 = vst [vmem:[%s1204_s10 + $0x50] sm:$0xff] %v450_v11  ;;  %540 = vst [vmem:[%s1204_s10 + $0xd0] sm:$0xff] %v498_v12 }
 0x148   : > { %525 = vst [vmem:[%s1204_s10 + $0x58] sm:$0xff] %v452_v15  ;;  %541 = vst [vmem:[%s1204_s10 + $0xd8] sm:$0xff] %v500_v16  ;;  %v455_v18 = vpop.f32.mrb[12].mxu0  ;;  %v503_v19 = vpop.f32.mrb[12].mxu1 }
 0x149   : > { %v456_v20 = vadd.f32 %v455_v18, %v1198_v0  ;;  %v504_v21 = vadd.f32 %v503_v19, %v346_v17  ;;  %v457_v22 = vpop.f32.mrb[13].mxu0  ;;  %v505_v23 = vpop.f32.mrb[13].mxu1 }
 0x14a   : > { %v458_v24 = vadd.f32 %v457_v22, %v1198_v0  ;;  %v506_v26 = vadd.f32 %v505_v23, %v346_v17 }
 0x14b   : > { %526 = vst [vmem:[%s1204_s10 + $0x60] sm:$0xff] %v456_v20  ;;  %542 = vst [vmem:[%s1204_s10 + $0xe0] sm:$0xff] %v504_v21 }
 0x14c   : > { %527 = vst [vmem:[%s1204_s10 + $0x68] sm:$0xff] %v458_v24  ;;  %543 = vst [vmem:[%s1204_s10 + $0xe8] sm:$0xff] %v506_v26  ;;  %v461_v28 = vpop.f32.mrb[14].mxu0  ;;  %v509_v29 = vpop.f32.mrb[14].mxu1 }
 0x14d   : > { %v462_v30 = vadd.f32 %v461_v28, %v1200_v25  ;;  %v510_v31 = vadd.f32 %v509_v29, %v351_v27  ;;  %v463_v0 = vpop.f32.mrb[15].mxu0  ;;  %v511_v32 = vpop.f32.mrb[15].mxu1 }
 0x14e   : > { %v464_v33 = vadd.f32 %v463_v0, %v1200_v25  ;;  %v512_v34 = vadd.f32 %v511_v32, %v351_v27 }
 0x14f   : > { %528 = vst [vmem:[%s1204_s10 + $0x70] sm:$0xff] %v462_v30  ;;  %544 = vst [vmem:[%s1204_s10 + $0xf0] sm:$0xff] %v510_v31 }
 0x150   : > { %529 = vst [vmem:[%s1204_s10 + $0x78] sm:$0xff] %v464_v33  ;;  %545 = vst [vmem:[%s1204_s10 + $0xf8] sm:$0xff] %v512_v34 }
 0x151   : > { %827 = shalt.err (!%p824_p5)
}
 0x152   : > { %s828_s19 = scalar_lea.hbm %s1246_s28, 4096  ;;  %s832_s8 = scalar_lea.hbm %s1305_s3, 8192 }
 0x153   : > { %p829_p4 = scmp.ne.s32.totalorder %s1246_s28, %s828_s19  ;;  %p833_p12 = scmp.lt.u32.totalorder %s1246_s28, %s1305_s3 }
 0x154   : > { %p834_p1 = scmp.lt.u32.totalorder %s832_s8, %s828_s19  ;;  %p836_p8 = scmp.lt.u32.totalorder %s828_s19, %s1246_s28 }
 0x155   : > { %p830_p7 = pnand %p829_p4, %p1313_p9 }
 0x156   : > { %p835_p3 = por %p834_p1, %p833_p12 }
 0x157   : > { %p831_p10 = pneg %p830_p7 }
 0x158   : > { %p837_p11 = por %p836_p8, %p835_p3 }
 0x15a   : > { %p838_p0 = pnand %p837_p11, %p831_p10 }
 0x15c   : > { %841 = shalt.err (!%p838_p0)
}
 0x15d   : > { %s904_s10 = smov 256   ;;  %s905_s18 = smov 16  }
 0x15e   : > { %716 = dma.vmem_to_hbm [thread:$0]  (%p1313_p9), %s1248_s22, 4096, %s1246_s28, %s547_s29, %s904_s10, %s904_s10, %s905_s18  }
 0x15f PF: > { %s577_s15 = sand.u32 1, %s876_s12   ;;  %p1314_p6 = scmp.ne.s32.totalorder %s1310_s27, 0 }
 0x160   : > { %p1315_p13 = scmp.ge.s32.totalorder %s896_s17, 2  ;;  %s578_s23 = scalar_lea.sflag [#allocation4], %s577_s15 }
 0x162   : > { %p723_p2 = pnand %p1315_p13, %p1314_p6 }
 0x164   : > { %871 = dma.done.wait (!%p723_p2), %s578_s23, 4096  }
 0x165   : > { %873 = vsyncadd (!%p723_p2), %s578_s23, 4294963200  ;;  %s19_s17 = sadd.s32 1, %s896_s17   ;;  %s1316_s12 = smov %s880_s13 }
 0x166   : > { %p16_p5 = scmp.ge.s32.totalorder %s19_s17, 4   ;;  %s1317_s13 = smov %s884_s14 }
 0x167   : > { %s1318_s14 = smov %s982_s26  ;;  %s1319_s15 = smov %s892_s16 }
 0x168   : > { %s1320_s16 = smov %s1322_s20  ;;  %18 = sbr.rel (!%p16_p5) target bundleno = 6 (0x6), region = 77 }
 0x16f   :  { %583 = vsyncpa [#allocation3], 1 }
 0x170   :  { %585 = vsyncpa [#allocation3 + $0x1], 1 }
 0x171   :  { %586 = vsyncpa [#allocation4], 1 }
 0x172   :  { %588 = vsyncpa [#allocation4 + $0x1], 1 }

// kernel: tpu_custom_call.1
= control target key start
LH: loop header
LB: loop body
LE: loop exit
PB: predicated region body
PF: predicated region fallthrough
CT: control target
= control target key end

     0   :  { %8 = vsyncpa [#allocation3], 0  ;;  %s1302_s0 = inlined_call_operand.hbm [shape: f32[2,128,256], index: 0, kind: input, shape index: {}]   ;;  %s1303_s1 = inlined_call_operand.vmem [shape: f32[128,128], index: 1, kind: input, shape index: {}]   ;;  %s1304_s2 = inlined_call_operand.vmem [shape: f32[128,1], index: 2, kind: input, shape index: {}]   ;;  %s1305_s3 = inlined_call_operand.hbm [shape: f32[2,128,256], index: 3, kind: output, shape index: {}]  }
   0x1   :  { %10 = vsyncpa [#allocation3 + $0x1], 0 }
   0x2   :  { %11 = vsyncpa [#allocation4], 0 }
   0x3   :  { %13 = vsyncpa [#allocation4 + $0x1], 0  ;;  %s926_s12 = smov 0   ;;  %s928_s13 = smov 0  }
   0x4   :  { %s930_s14 = smov 0   ;;  %s932_s15 = smov 0  }
   0x5   :  { %s934_s16 = smov 0   ;;  %s936_s17 = smov 0  }
   0x6 LB: > { %s649_s18 = sadd.s32 4294967295, %s896_s17   ;;  %s650_s19 = sadd.s32 4294967294, %s896_s17   ;;  %s896_s17 = sphi %s936_s17, %s19_s17   ;;  %s892_s16 = sphi %s934_s16, %s1320_s16   ;;  %s888_s15 = sphi %s932_s15, %s1319_s15   ;;  %s884_s14 = sphi %s930_s14, %s1318_s14   ;;  %s880_s13 = sphi %s928_s13, %s1317_s13   ;;  %s876_s12 = sphi %s926_s12, %s1316_s12  }
   0x7   : > { %s31_s20 = sadd.s32 1, %s892_s16  ;;  %s40_s21 = sadd.s32 1, %s884_s14 }
   0x8   : > { %p33_p0 = scmp.ge.s32.totalorder %s31_s20, 2  ;;  %p47_p1 = scmp.ne.s32.totalorder %s884_s14, %s880_s13 }
   0x9   : > { %p48_p2 = scmp.eq.s32.totalorder %s896_s17, 0  ;;  %p53_p3 = scmp.ne.s32.totalorder %s880_s13, %s876_s12 }
   0xa   : > { %s1322_s20 = smov (%p33_p0, %s31_s20), 0  ;;  %p54_p5 = scmp.eq.s32.totalorder %s649_s18, 0 }
   0xb   : > { %p967_p4 = por %p48_p2, %p47_p1  ;;  %s35_s23 = ssub.s32 %s892_s16, %s1322_s20 }
   0xc   : > { %p121_p6 = scmp.eq.s32.totalorder %s649_s18, 1  ;;  %p38_p7 = scmp.eq.s32.totalorder %s35_s23, 0 }
   0xd   : > { %p973_p8 = por %p54_p5, %p53_p3  ;;  %p127_p10 = scmp.eq.s32.totalorder %s650_s19, 1 }
   0xe   : > { %p977_p9 = por %p121_p6, %p47_p1  ;;  %p726_p13 = scmp.lt.s32.totalorder %s896_s17, 2 }
   0xf   : > { %s982_s26 = scalar_select %p38_p7, %s884_s14, %s40_s21  }
  0x10   : > { %s1309_s25 = scalar_select %p977_p9, 1, 0 }
  0x11   : > { %p984_p11 = por %p127_p10, %p53_p3  ;;  %s153_s28 = sand.u32 1, %s884_s14  }
  0x12   : > { %s653_s29 = sshll.u32 %s153_s28, 8  ;;  %s664_s30 = sshll.u32 %s892_s16, 12 }
  0x13   : > { %s1310_s27 = scalar_select %p984_p11, 1, 0 }
  0x14   : > { %s995_s6 = scalar_lea.hbm %s1302_s0, %s664_s30  ;;  %s157_s7 = scalar_lea.vmem [#allocation2], %s653_s29 }
  0x15   : > { %s166_s8 = sshll.u32 %s157_s7, 4  ;;  %p1001_p0 = pnand %p726_p13, %p967_p4  ;;  %s997_s8 = int_to_ptr.vmem [resolvable:$true] %s166_s8 }
  0x16   : > { %s1006_s10 = scalar_lea.sflag [#allocation3], %s153_s28  ;;  %s784_s11 = scalar_lea.hbm %s995_s6, 4096 }
  0x17   : > { %p785_p2 = scmp.ne.s32.totalorder %s995_s6, %s784_s11  ;;  %p786_p3 = pneg %p1001_p0 }
  0x18   : > { %s789_s21 = scalar_lea.hbm %s1302_s0, 8192  ;;  %p790_p4 = scmp.lt.u32.totalorder %s995_s6, %s1302_s0 }
  0x19   : > { %p787_p5 = pnand %p786_p3, %p785_p2  ;;  %p791_p7 = scmp.lt.u32.totalorder %s789_s21, %s784_s11 }
  0x1a   : > { %p793_p13 = scmp.lt.u32.totalorder %s784_s11, %s995_s6 }
  0x1b   : > { %p788_p6 = pneg %p787_p5  ;;  %p792_p10 = por %p791_p7, %p790_p4 }
  0x1d   : > { %p794_p12 = por %p793_p13, %p792_p10 }
  0x1f   : > { %p795_p1 = pnand %p794_p12, %p788_p6 }
  0x21   : > { %798 = shalt.err (!%p795_p1)
}
  0x22   : > { %s799_s28 = scalar_lea.vmem %s997_s8, 4096  ;;  %s898_s29 = smov [#allocation2]  }
  0x23   : > { %p800_p2 = scmp.ne.s32.totalorder %s997_s8, %s799_s28  ;;  %s804_s30 = sshll.u32 %s898_s29, 4  ;;  %s805_s30 = int_to_ptr.vmem [resolvable:$false] %s804_s30 }
  0x24   : > { %s806_s4 = scalar_lea.vmem %s805_s30, 8192  ;;  %p807_p9 = scmp.lt.s32.totalorder %s997_s8, %s805_s30 }
  0x25   : > { %p802_p5 = pnand %p800_p2, %p786_p3  ;;  %p808_p4 = scmp.lt.s32.totalorder %s806_s4, %s799_s28 }
  0x27   : > { %p803_p11 = pneg %p802_p5  ;;  %p809_p7 = por %p808_p4, %p807_p9 }
  0x29   : > { %p810_p10 = pnand %p809_p7, %p803_p11 }
  0x2b   : > { %813 = shalt.err (!%p810_p10)
}
  0x2c   : > { %s899_s5 = smov 256   ;;  %s900_s7 = smov 16  }
  0x2d   : > { %721 = dma.hbm_to_vmem [thread:$0]  (!%p1001_p0), %s995_s6, 4096, %s997_s8, %s1006_s10, %s899_s5, %s899_s5, %s900_s7  }
  0x2e   : > { %p174_p12 = scmp.lt.s32.totalorder %s896_s17, 3  ;;  %p1312_p1 = scmp.ge.s32.totalorder %s896_s17, 1 }
  0x30   : > { %p175_p3 = pnand %p1312_p1, %p174_p12 }
  0x31   : > { %s1038_s11 = sand.u32 (!%p175_p3), 1, %s880_s13  }
  0x32   : > { %178 = sbr.rel (%p175_p3) target bundleno = 351 (0x15f), region = 32  ;;  %s657_s18 = sshll.u32 (!%p175_p3), %s1038_s11, 8 }
  0x33   : > { %s181_s19 = scalar_lea.sflag (!%p175_p3), [#allocation3], %s1038_s11  ;;  %s1044_s21 = scalar_lea.vmem (!%p175_p3), [#allocation2], %s657_s18 }
  0x39   : > { %867 = dma.done.wait (%p973_p8), %s181_s19, 4096  }
  0x3a   : > { %869 = vsyncadd (%p973_p8), %s181_s19, 4294963200  ;;  %v901_v0 = vmov 0.0   ;;  %v902_v1 = vmov 0   ;;  %v210_v2 = vld [vmem:[%s1044_s21 + $0x8] sm:$0xff]  ;;  %v212_v3 = vld [vmem:[%s1044_s21 + $0x18] sm:$0xff]  ;;  %s1204_s10 = scalar_lea.vmem [#allocation5], %s657_s18 }
  0x3b   : > { %417 = vmatprep.mubr.f32.mxu0 %v901_v0  ;;  %465 = vmatprep.mubr.f32.mxu1 %v901_v0  ;;  %v209_v4 = vld [vmem:[%s1044_s21] sm:$0xff]  ;;  %v666_v5 = vpack.c.bf16 %v212_v3, %v210_v2  ;;  %v211_v6 = vld [vmem:[%s1044_s21 + $0x10] sm:$0xff]  ;;  %v214_v7 = vld [vmem:[%s1044_s21 + $0x28] sm:$0xff]  ;;  %s665_s18 = sshll.u32 %s888_s15, 12  ;;  %s562_s22 = sshll.u32 %s1204_s10, 4  ;;  %s1248_s22 = int_to_ptr.vmem [resolvable:$true] %s562_s22 }
  0x3c   : > { %783 = vset.pattern.permute.xlu1 %v902_v1  ;;  %782 = vset.pattern.permute.xlu0 %v902_v1  ;;  %v216_v8 = vld [vmem:[%s1044_s21 + $0x38] sm:$0xff]  ;;  %v668_v9 = vpack.c.bf16 %v211_v6, %v209_v4  ;;  %v213_v11 = vld [vmem:[%s1044_s21 + $0x20] sm:$0xff]  ;;  %v215_v12 = vld [vmem:[%s1044_s21 + $0x30] sm:$0xff]  ;;  %s1246_s28 = scalar_lea.hbm %s1305_s3, %s665_s18  ;;  %s547_s29 = scalar_lea.sflag [#allocation4], %s1038_s11 }
  0x3d   : > { %v670_v10 = vpack.c.bf16 %v216_v8, %v214_v7  ;;  %v218_v13 = vld [vmem:[%s1044_s21 + $0x48] sm:$0xff]  ;;  %667 = vmatprep.subr.bf16.mxu0 %v666_v5  ;;  %698 = vmatprep.subr.bf16.mxu1 %v666_v5  ;;  %v220_v14 = vld [vmem:[%s1044_s21 + $0x58] sm:$0xff]  ;;  %v672_v15 = vpack.c.bf16 %v215_v12, %v213_v11  ;;  %v217_v17 = vld [vmem:[%s1044_s21 + $0x40] sm:$0xff]  ;;  %s814_s30 = scalar_lea.vmem %s1248_s22, 4096  ;;  %p1313_p9 = scmp.ne.s32.totalorder %s1309_s25, 0 }
  0x3e   : > { %669 = vmatpush1.bf16.msra.mxu0 %v668_v9  ;;  %706 = vmatpush1.bf16.msra.mxu1 %v668_v9  ;;  %v674_v16 = vpack.c.bf16 %v220_v14, %v218_v13  ;;  %v219_v18 = vld [vmem:[%s1044_s21 + $0x50] sm:$0xff]  ;;  %v222_v19 = vld [vmem:[%s1044_s21 + $0x68] sm:$0xff]  ;;  %v224_v20 = vld [vmem:[%s1044_s21 + $0x78] sm:$0xff]  ;;  %p815_p8 = scmp.ne.s32.totalorder %s1248_s22, %s814_s30  ;;  %s903_s4 = smov [#allocation5]  }
  0x3f   : > { %671 = vmatprep.subr.bf16.mxu0 %v670_v10  ;;  %699 = vmatprep.subr.bf16.mxu1 %v670_v10  ;;  %v676_v21 = vpack.c.bf16 %v219_v18, %v217_v17  ;;  %v678_v22 = vpack.c.bf16 %v224_v20, %v222_v19  ;;  %v221_v23 = vld [vmem:[%s1044_s21 + $0x60] sm:$0xff]  ;;  %v223_v24 = vld [vmem:[%s1044_s21 + $0x70] sm:$0xff]  ;;  %v226_v25 = vld [vmem:[%s1044_s21 + $0x88] sm:$0xff]  ;;  %s818_s5 = sshll.u32 %s903_s4, 4  ;;  %s819_s5 = int_to_ptr.vmem [resolvable:$false] %s818_s5 }
  0x40   : > { %v228_v26 = vld [vmem:[%s1044_s21 + $0x98] sm:$0xff]  ;;  %v680_v27 = vpack.c.bf16 %v223_v24, %v221_v23  ;;  %v225_v29 = vld [vmem:[%s1044_s21 + $0x80] sm:$0xff]  ;;  %v227_v30 = vld [vmem:[%s1044_s21 + $0x90] sm:$0xff]  ;;  %p816_p11 = pnand %p815_p8, %p1313_p9  ;;  %s820_s7 = scalar_lea.vmem %s819_s5, 8192 }
  0x41   : > { %v682_v28 = vpack.c.bf16 %v228_v26, %v226_v25  ;;  %v230_v31 = vld [vmem:[%s1044_s21 + $0xa8] sm:$0xff]  ;;  %v232_v32 = vld [vmem:[%s1044_s21 + $0xb8] sm:$0xff]  ;;  %v684_v33 = vpack.c.bf16 %v227_v30, %v225_v29  ;;  %v259_v34 = vld [vmem:[%s1304_s2 + $0x10] sm:$0xff]  ;;  %p821_p6 = scmp.lt.s32.totalorder %s1248_s22, %s819_s5  ;;  %p822_p13 = scmp.lt.s32.totalorder %s820_s7, %s814_s30 }
  0x42   : > { %673 = vmatpush1.bf16.msra.mxu0 %v672_v15  ;;  %707 = vmatpush1.bf16.msra.mxu1 %v672_v15  ;;  %v257_v35 = vld [vmem:[%s1304_s2] sm:$0xff]  ;;  %v686_v36 = vpack.c.bf16 %v232_v32, %v230_v31  ;;  %v231_v38 = vld [vmem:[%s1044_s21 + $0xb0] sm:$0xff]  ;;  %v234_v39 = vld [vmem:[%s1044_s21 + $0xc8] sm:$0xff]  ;;  %p817_p0 = pneg %p816_p11 }
  0x43   : > { %675 = vmatprep.subr.bf16.mxu0 %v674_v16  ;;  %700 = vmatprep.subr.bf16.mxu1 %v674_v16  ;;  %v229_v37 = vld [vmem:[%s1044_s21 + $0xa0] sm:$0xff]  ;;  %v236_v40 = vld [vmem:[%s1044_s21 + $0xd8] sm:$0xff]  ;;  %v258_v42 = vld [vmem:[%s1304_s2 + $0x8] sm:$0xff]  ;;  %p823_p2 = por %p822_p13, %p821_p6 }
  0x44   : > { %285 = vperm.xlu1 %783, %v259_v34   ;;  %275 = vperm.xlu0 %782, %v257_v35   ;;  %v260_v41 = vld [vmem:[%s1304_s2 + $0x18] sm:$0xff]  ;;  %v688_v43 = vpack.c.bf16 %v231_v38, %v229_v37  ;;  %v690_v44 = vpack.c.bf16 %v236_v40, %v234_v39  ;;  %v233_v45 = vld [vmem:[%s1044_s21 + $0xc0] sm:$0xff]  ;;  %v235_v46 = vld [vmem:[%s1044_s21 + $0xd0] sm:$0xff] }
  0x45   : > { %v238_v47 = vld [vmem:[%s1044_s21 + $0xe8] sm:$0xff]  ;;  %v240_v48 = vld [vmem:[%s1044_s21 + $0xf8] sm:$0xff]  ;;  %v261_v50 = vld [vmem:[%s1304_s2 + $0x20] sm:$0xff]  ;;  %v692_v51 = vpack.c.bf16 %v235_v46, %v233_v45  ;;  %p824_p5 = pnand %p823_p2, %p817_p0 }
  0x46   : > { %677 = vmatpush1.bf16.msra.mxu0 %v676_v21  ;;  %708 = vmatpush1.bf16.msra.mxu1 %v676_v21  ;;  %v262_v49 = vld [vmem:[%s1304_s2 + $0x28] sm:$0xff]  ;;  %v694_v52 = vpack.c.bf16 %v240_v48, %v238_v47  ;;  %v237_v53 = vld [vmem:[%s1044_s21 + $0xe0] sm:$0xff]  ;;  %v239_v54 = vld [vmem:[%s1044_s21 + $0xf0] sm:$0xff] }
  0x47   : > { %679 = vmatprep.subr.bf16.mxu0 %v678_v22  ;;  %701 = vmatprep.subr.bf16.mxu1 %v678_v22  ;;  %v264_v55 = vld [vmem:[%s1304_s2 + $0x38] sm:$0xff]  ;;  %v263_v56 = vld [vmem:[%s1304_s2 + $0x30] sm:$0xff]  ;;  %v696_v57 = vpack.c.bf16 %v239_v54, %v237_v53  ;;  %v266_v58 = vld [vmem:[%s1304_s2 + $0x48] sm:$0xff] }
  0x48   : > { %290 = vperm.xlu1 %783, %v260_v41   ;;  %280 = vperm.xlu0 %782, %v258_v42   ;;  %v265_v59 = vld [vmem:[%s1304_s2 + $0x40] sm:$0xff]  ;;  %v268_v62 = vld [vmem:[%s1304_s2 + $0x58] sm:$0xff]  ;;  %v267_v63 = vld [vmem:[%s1304_s2 + $0x50] sm:$0xff] }
  0x49   : > { %v241_v60 = vld [vmem:[%s1303_s1] sm:$0xff]  ;;  %v242_v1 = vld [vmem:[%s1303_s1 + $0x8] sm:$0xff]  ;;  %v243_v5 = vld [vmem:[%s1303_s1 + $0x10] sm:$0xff] }
  0x4a   : > { %681 = vmatpush1.bf16.msra.mxu0 %v680_v27  ;;  %709 = vmatpush1.bf16.msra.mxu1 %v680_v27  ;;  %v249_v61 = vld [vmem:[%s1303_s1 + $0x40] sm:$0xff]  ;;  %v250_v2 = vld [vmem:[%s1303_s1 + $0x48] sm:$0xff]  ;;  %v251_v6 = vld [vmem:[%s1303_s1 + $0x50] sm:$0xff] }
  0x4b   : > { %683 = vmatprep.subr.bf16.mxu0 %v682_v28  ;;  %702 = vmatprep.subr.bf16.mxu1 %v682_v28  ;;  %v270_v3 = vld [vmem:[%s1304_s2 + $0x68] sm:$0xff]  ;;  %v269_v4 = vld [vmem:[%s1304_s2 + $0x60] sm:$0xff]  ;;  %v272_v7 = vld [vmem:[%s1304_s2 + $0x78] sm:$0xff] }
  0x4c   : > { %300 = vperm.xlu1 %783, %v262_v49   ;;  %295 = vperm.xlu0 %782, %v261_v50   ;;  %v271_v8 = vld [vmem:[%s1304_s2 + $0x70] sm:$0xff]  ;;  %v244_v9 = vld [vmem:[%s1303_s1 + $0x18] sm:$0xff]  ;;  %v245_v11 = vld [vmem:[%s1303_s1 + $0x20] sm:$0xff] }
  0x4d   : > { %v252_v10 = vld [vmem:[%s1303_s1 + $0x58] sm:$0xff]  ;;  %v253_v12 = vld [vmem:[%s1303_s1 + $0x60] sm:$0xff]  ;;  %v246_v13 = vld [vmem:[%s1303_s1 + $0x28] sm:$0xff] }
  0x4e   : > { %685 = vmatpush1.bf16.msra.mxu0 %v684_v33  ;;  %710 = vmatpush1.bf16.msra.mxu1 %v684_v33  ;;  %v254_v14 = vld [vmem:[%s1303_s1 + $0x68] sm:$0xff]  ;;  %v247_v15 = vld [vmem:[%s1303_s1 + $0x30] sm:$0xff]  ;;  %v248_v17 = vld [vmem:[%s1303_s1 + $0x38] sm:$0xff] }
  0x4f   : > { %687 = vmatprep.subr.bf16.mxu0 %v686_v36  ;;  %703 = vmatprep.subr.bf16.mxu1 %v686_v36  ;;  %v255_v16 = vld [vmem:[%s1303_s1 + $0x70] sm:$0xff]  ;;  %v256_v18 = vld [vmem:[%s1303_s1 + $0x78] sm:$0xff] }
  0x50   : > { %310 = vperm.xlu1 %783, %v264_v55   ;;  %305 = vperm.xlu0 %782, %v263_v56  }
  0x52   : > { %689 = vmatpush1.bf16.msra.mxu0 %v688_v43  ;;  %711 = vmatpush1.bf16.msra.mxu1 %v688_v43 }
  0x53   : > { %691 = vmatprep.subr.bf16.mxu0 %v690_v44  ;;  %704 = vmatprep.subr.bf16.mxu1 %v690_v44 }
  0x54   : > { %320 = vperm.xlu1 %783, %v266_v58   ;;  %315 = vperm.xlu0 %782, %v265_v59  }
  0x56   : > { %693 = vmatpush1.bf16.msra.mxu0 %v692_v51  ;;  %712 = vmatpush1.bf16.msra.mxu1 %v692_v51 }
  0x57   : > { %695 = vmatprep.subr.bf16.mxu0 %v694_v52  ;;  %705 = vmatprep.subr.bf16.mxu1 %v694_v52 }
  0x58   : > { %330 = vperm.xlu1 %783, %v268_v62   ;;  %325 = vperm.xlu0 %782, %v267_v63  }
  0x5a   : > { %697 = vmatpush1.bf16.msra.mxu0 %v696_v57  ;;  %713 = vmatpush1.bf16.msra.mxu1 %v696_v57 }
  0x5c   : > { %340 = vperm.xlu1 %783, %v270_v3   ;;  %335 = vperm.xlu0 %782, %v269_v4  }
  0x5d   : > { %418 = vmatmul.mubr.f32.vlgmr.msra.gmra.mrb[0].mxu0 %v241_v60  ;;  %466 = vmatmul.mubr.f32.vlgmr.msra.gmra.mrb[0].mxu1 %v249_v61 }
  0x5e   : > { %423 = vmatprep.mubr.f32.mxu0 %v901_v0  ;;  %471 = vmatprep.mubr.f32.mxu1 %v901_v0 }
  0x60   : > { %350 = vperm.xlu1 %783, %v272_v7   ;;  %345 = vperm.xlu0 %782, %v271_v8  }
  0x61   : > { %424 = vmatmul.mubr.f32.gmra.mrb[2].mxu0 %v242_v1  ;;  %472 = vmatmul.mubr.f32.gmra.mrb[2].mxu1 %v250_v2 }
  0x62   : > { %429 = vmatprep.mubr.f32.mxu0 %v901_v0  ;;  %477 = vmatprep.mubr.f32.mxu1 %v901_v0 }
  0x65   : > { %430 = vmatmul.mubr.f32.gmra.mrb[4].mxu0 %v243_v5  ;;  %478 = vmatmul.mubr.f32.gmra.mrb[4].mxu1 %v251_v6 }
  0x66   : > { %435 = vmatprep.mubr.f32.mxu0 %v901_v0  ;;  %483 = vmatprep.mubr.f32.mxu1 %v901_v0 }
  0x69   : > { %436 = vmatmul.mubr.f32.gmra.mrb[6].mxu0 %v244_v9  ;;  %484 = vmatmul.mubr.f32.gmra.mrb[6].mxu1 %v252_v10 }
  0x6a   : > { %441 = vmatprep.mubr.f32.mxu0 %v901_v0  ;;  %489 = vmatprep.mubr.f32.mxu1 %v901_v0 }
  0x6d   : > { %442 = vmatmul.mubr.f32.gmra.mrb[8].mxu0 %v245_v11  ;;  %490 = vmatmul.mubr.f32.gmra.mrb[8].mxu1 %v253_v12 }
  0x6e   : > { %447 = vmatprep.mubr.f32.mxu0 %v901_v0  ;;  %495 = vmatprep.mubr.f32.mxu1 %v901_v0 }
  0x71   : > { %448 = vmatmul.mubr.f32.gmra.mrb[10].mxu0 %v246_v13  ;;  %496 = vmatmul.mubr.f32.gmra.mrb[10].mxu1 %v254_v14 }
  0x72   : > { %453 = vmatprep.mubr.f32.mxu0 %v901_v0  ;;  %501 = vmatprep.mubr.f32.mxu1 %v901_v0 }
  0x75   : > { %454 = vmatmul.mubr.f32.gmra.mrb[12].mxu0 %v247_v15  ;;  %502 = vmatmul.mubr.f32.gmra.mrb[12].mxu1 %v255_v16 }
  0x76   : > { %459 = vmatprep.mubr.f32.mxu0 %v901_v0  ;;  %507 = vmatprep.mubr.f32.mxu1 %v901_v0 }
  0x79   : > { %460 = vmatmul.mubr.f32.gmra.mrb[14].mxu0 %v248_v17  ;;  %508 = vmatmul.mubr.f32.gmra.mrb[14].mxu1 %v256_v18 }
  0xc3   : > { %v276_v19 = vpop.permute.xlu0 %275  ;;  %v286_v20 = vpop.permute.xlu1 %285 }
  0xc7   : > { %v281_v21 = vpop.permute.xlu0 %280  ;;  %v291_v22 = vpop.permute.xlu1 %290 }
  0xcb   : > { %v1194_v23 = vpop.permute.xlu0 %295  ;;  %v1196_v24 = vpop.permute.xlu1 %300 }
  0xcf   : > { %v1198_v0 = vpop.permute.xlu0 %305  ;;  %v1200_v25 = vpop.permute.xlu1 %310 }
  0xd3   : > { %v316_v26 = vpop.permute.xlu0 %315  ;;  %v321_v35 = vpop.permute.xlu1 %320 }
  0xd7   : > { %v326_v44 = vpop.permute.xlu0 %325  ;;  %v331_v53 = vpop.permute.xlu1 %330 }
  0xdb   : > { %v336_v62 = vpop.permute.xlu0 %335  ;;  %v341_v8 = vpop.permute.xlu1 %340 }
  0xdf   : > { %v346_v17 = vpop.permute.xlu0 %345 }
 0x130   : > { %v419_v27 = vpop.f32.mrb[0].mxu0  ;;  %v467_v28 = vpop.f32.mrb[0].mxu1 }
 0x131   : > { %v420_v29 = vadd.f32 %v419_v27, %v276_v19  ;;  %v468_v30 = vadd.f32 %v467_v28, %v316_v26  ;;  %v421_v31 = vpop.f32.mrb[1].mxu0  ;;  %v469_v32 = vpop.f32.mrb[1].mxu1 }
 0x132   : > { %v422_v33 = vadd.f32 %v421_v31, %v276_v19  ;;  %v470_v34 = vadd.f32 %v469_v32, %v316_v26  ;;  %v351_v27 = vpop.permute.xlu1 %350 }
 0x133   : > { %514 = vst [vmem:[%s1204_s10] sm:$0xff] %v420_v29  ;;  %530 = vst [vmem:[%s1204_s10 + $0x80] sm:$0xff] %v468_v30 }
 0x134   : > { %515 = vst [vmem:[%s1204_s10 + $0x8] sm:$0xff] %v422_v33  ;;  %531 = vst [vmem:[%s1204_s10 + $0x88] sm:$0xff] %v470_v34  ;;  %v425_v36 = vpop.f32.mrb[2].mxu0  ;;  %v473_v37 = vpop.f32.mrb[2].mxu1 }
 0x135   : > { %v426_v38 = vadd.f32 %v425_v36, %v281_v21  ;;  %v474_v39 = vadd.f32 %v473_v37, %v321_v35  ;;  %v427_v40 = vpop.f32.mrb[3].mxu0  ;;  %v475_v41 = vpop.f32.mrb[3].mxu1 }
 0x136   : > { %v428_v42 = vadd.f32 %v427_v40, %v281_v21  ;;  %v476_v43 = vadd.f32 %v475_v41, %v321_v35 }
 0x137   : > { %516 = vst [vmem:[%s1204_s10 + $0x10] sm:$0xff] %v426_v38  ;;  %532 = vst [vmem:[%s1204_s10 + $0x90] sm:$0xff] %v474_v39 }
 0x138   : > { %517 = vst [vmem:[%s1204_s10 + $0x18] sm:$0xff] %v428_v42  ;;  %533 = vst [vmem:[%s1204_s10 + $0x98] sm:$0xff] %v476_v43  ;;  %v431_v45 = vpop.f32.mrb[4].mxu0  ;;  %v479_v46 = vpop.f32.mrb[4].mxu1 }
 0x139   : > { %v432_v47 = vadd.f32 %v431_v45, %v286_v20  ;;  %v480_v48 = vadd.f32 %v479_v46, %v326_v44  ;;  %v433_v49 = vpop.f32.mrb[5].mxu0  ;;  %v481_v50 = vpop.f32.mrb[5].mxu1 }
 0x13a   : > { %v434_v51 = vadd.f32 %v433_v49, %v286_v20  ;;  %v482_v52 = vadd.f32 %v481_v50, %v326_v44 }
 0x13b   : > { %518 = vst [vmem:[%s1204_s10 + $0x20] sm:$0xff] %v432_v47  ;;  %534 = vst [vmem:[%s1204_s10 + $0xa0] sm:$0xff] %v480_v48 }
 0x13c   : > { %519 = vst [vmem:[%s1204_s10 + $0x28] sm:$0xff] %v434_v51  ;;  %535 = vst [vmem:[%s1204_s10 + $0xa8] sm:$0xff] %v482_v52  ;;  %v437_v54 = vpop.f32.mrb[6].mxu0  ;;  %v485_v55 = vpop.f32.mrb[6].mxu1 }
 0x13d   : > { %v438_v56 = vadd.f32 %v437_v54, %v291_v22  ;;  %v486_v57 = vadd.f32 %v485_v55, %v331_v53  ;;  %v439_v58 = vpop.f32.mrb[7].mxu0  ;;  %v487_v59 = vpop.f32.mrb[7].mxu1 }
 0x13e   : > { %v440_v60 = vadd.f32 %v439_v58, %v291_v22  ;;  %v488_v61 = vadd.f32 %v487_v59, %v331_v53 }
 0x13f   : > { %520 = vst [vmem:[%s1204_s10 + $0x30] sm:$0xff] %v438_v56  ;;  %536 = vst [vmem:[%s1204_s10 + $0xb0] sm:$0xff] %v486_v57 }
 0x140   : > { %521 = vst [vmem:[%s1204_s10 + $0x38] sm:$0xff] %v440_v60  ;;  %537 = vst [vmem:[%s1204_s10 + $0xb8] sm:$0xff] %v488_v61  ;;  %v443_v63 = vpop.f32.mrb[8].mxu0  ;;  %v491_v1 = vpop.f32.mrb[8].mxu1 }
 0x141   : > { %v444_v2 = vadd.f32 %v443_v63, %v1194_v23  ;;  %v492_v3 = vadd.f32 %v491_v1, %v336_v62  ;;  %v445_v4 = vpop.f32.mrb[9].mxu0  ;;  %v493_v5 = vpop.f32.mrb[9].mxu1 }
 0x142   : > { %v446_v6 = vadd.f32 %v445_v4, %v1194_v23  ;;  %v494_v7 = vadd.f32 %v493_v5, %v336_v62 }
 0x143   : > { %522 = vst [vmem:[%s1204_s10 + $0x40] sm:$0xff] %v444_v2  ;;  %538 = vst [vmem:[%s1204_s10 + $0xc0] sm:$0xff] %v492_v3 }
 0x144   : > { %523 = vst [vmem:[%s1204_s10 + $0x48] sm:$0xff] %v446_v6  ;;  %539 = vst [vmem:[%s1204_s10 + $0xc8] sm:$0xff] %v494_v7  ;;  %v449_v9 = vpop.f32.mrb[10].mxu0  ;;  %v497_v10 = vpop.f32.mrb[10].mxu1 }
 0x145   : > { %v450_v11 = vadd.f32 %v449_v9, %v1196_v24  ;;  %v498_v12 = vadd.f32 %v497_v10, %v341_v8  ;;  %v451_v13 = vpop.f32.mrb[11].mxu0  ;;  %v499_v14 = vpop.f32.mrb[11].mxu1 }
 0x146   : > { %v452_v15 = vadd.f32 %v451_v13, %v1196_v24  ;;  %v500_v16 = vadd.f32 %v499_v14, %v341_v8 }
 0x147   : > { %524 = vst [vmem:[%s1204_s10 + $0x50] sm:$0xff] %v450_v11  ;;  %540 = vst [vmem:[%s1204_s10 + $0xd0] sm:$0xff] %v498_v12 }
 0x148   : > { %525 = vst [vmem:[%s1204_s10 + $0x58] sm:$0xff] %v452_v15  ;;  %541 = vst [vmem:[%s1204_s10 + $0xd8] sm:$0xff] %v500_v16  ;;  %v455_v18 = vpop.f32.mrb[12].mxu0  ;;  %v503_v19 = vpop.f32.mrb[12].mxu1 }
 0x149   : > { %v456_v20 = vadd.f32 %v455_v18, %v1198_v0  ;;  %v504_v21 = vadd.f32 %v503_v19, %v346_v17  ;;  %v457_v22 = vpop.f32.mrb[13].mxu0  ;;  %v505_v23 = vpop.f32.mrb[13].mxu1 }
 0x14a   : > { %v458_v24 = vadd.f32 %v457_v22, %v1198_v0  ;;  %v506_v26 = vadd.f32 %v505_v23, %v346_v17 }
 0x14b   : > { %526 = vst [vmem:[%s1204_s10 + $0x60] sm:$0xff] %v456_v20  ;;  %542 = vst [vmem:[%s1204_s10 + $0xe0] sm:$0xff] %v504_v21 }
 0x14c   : > { %527 = vst [vmem:[%s1204_s10 + $0x68] sm:$0xff] %v458_v24  ;;  %543 = vst [vmem:[%s1204_s10 + $0xe8] sm:$0xff] %v506_v26  ;;  %v461_v28 = vpop.f32.mrb[14].mxu0  ;;  %v509_v29 = vpop.f32.mrb[14].mxu1 }
 0x14d   : > { %v462_v30 = vadd.f32 %v461_v28, %v1200_v25  ;;  %v510_v31 = vadd.f32 %v509_v29, %v351_v27  ;;  %v463_v0 = vpop.f32.mrb[15].mxu0  ;;  %v511_v32 = vpop.f32.mrb[15].mxu1 }
 0x14e   : > { %v464_v33 = vadd.f32 %v463_v0, %v1200_v25  ;;  %v512_v34 = vadd.f32 %v511_v32, %v351_v27 }
 0x14f   : > { %528 = vst [vmem:[%s1204_s10 + $0x70] sm:$0xff] %v462_v30  ;;  %544 = vst [vmem:[%s1204_s10 + $0xf0] sm:$0xff] %v510_v31 }
 0x150   : > { %529 = vst [vmem:[%s1204_s10 + $0x78] sm:$0xff] %v464_v33  ;;  %545 = vst [vmem:[%s1204_s10 + $0xf8] sm:$0xff] %v512_v34 }
 0x151   : > { %827 = shalt.err (!%p824_p5)
}
 0x152   : > { %s828_s19 = scalar_lea.hbm %s1246_s28, 4096  ;;  %s832_s8 = scalar_lea.hbm %s1305_s3, 8192 }
 0x153   : > { %p829_p4 = scmp.ne.s32.totalorder %s1246_s28, %s828_s19  ;;  %p833_p12 = scmp.lt.u32.totalorder %s1246_s28, %s1305_s3 }
 0x154   : > { %p834_p1 = scmp.lt.u32.totalorder %s832_s8, %s828_s19  ;;  %p836_p8 = scmp.lt.u32.totalorder %s828_s19, %s1246_s28 }
 0x155   : > { %p830_p7 = pnand %p829_p4, %p1313_p9 }
 0x156   : > { %p835_p3 = por %p834_p1, %p833_p12 }
 0x157   : > { %p831_p10 = pneg %p830_p7 }
 0x158   : > { %p837_p11 = por %p836_p8, %p835_p3 }
 0x15a   : > { %p838_p0 = pnand %p837_p11, %p831_p10 }
 0x15c   : > { %841 = shalt.err (!%p838_p0)
}
 0x15d   : > { %s904_s10 = smov 256   ;;  %s905_s18 = smov 16  }
 0x15e   : > { %716 = dma.vmem_to_hbm [thread:$0]  (%p1313_p9), %s1248_s22, 4096, %s1246_s28, %s547_s29, %s904_s10, %s904_s10, %s905_s18  }
 0x15f PF: > { %s577_s15 = sand.u32 1, %s876_s12   ;;  %p1314_p6 = scmp.ne.s32.totalorder %s1310_s27, 0 }
 0x160   : > { %p1315_p13 = scmp.ge.s32.totalorder %s896_s17, 2  ;;  %s578_s23 = scalar_lea.sflag [#allocation4], %s577_s15 }
 0x162   : > { %p723_p2 = pnand %p1315_p13, %p1314_p6 }
 0x164   : > { %871 = dma.done.wait (!%p723_p2), %s578_s23, 4096  }
 0x165   : > { %873 = vsyncadd (!%p723_p2), %s578_s23, 4294963200  ;;  %s19_s17 = sadd.s32 1, %s896_s17   ;;  %s1316_s12 = smov %s880_s13 }
 0x166   : > { %p16_p5 = scmp.ge.s32.totalorder %s19_s17, 4   ;;  %s1317_s13 = smov %s884_s14 }
 0x167   : > { %s1318_s14 = smov %s982_s26  ;;  %s1319_s15 = smov %s892_s16 }
 0x168   : > { %s1320_s16 = smov %s1322_s20  ;;  %18 = sbr.rel (!%p16_p5) target bundleno = 6 (0x6), region = 77 }
 0x16f   :  { %583 = vsyncpa [#allocation3], 1 }
 0x170   :  { %585 = vsyncpa [#allocation3 + $0x1], 1 }
 0x171   :  { %586 = vsyncpa [#allocation4], 1 }
 0x172   :  { %588 = vsyncpa [#allocation4 + $0x1], 1 }

</bundles_post_ra>
